<compile_context>
chip_gen: v7x
topology: tpu7x:2x2x1
jax: 0.10.0
libtpu: 0.0.40
codegen_flags: <defaults>
</compile_context>

<pallas_src>
import jax
import jax.numpy as jnp
from jax.experimental import pallas as pl
from jax.experimental.pallas import tpu as pltpu

EPS = 1e-5  # nn.LayerNorm default eps


def _round_up(x, m):
    return ((x + m - 1) // m) * m


def _layernorm(x, gamma, beta):
    # Single-pass formulation: s1 and s2 are independent reductions that can
    # be co-issued, instead of the serial mean -> subtract -> square -> mean.
    inv_f = jnp.float32(1.0 / x.shape[-1])
    s1 = jnp.sum(x, axis=-1, keepdims=True)
    s2 = jnp.sum(x * x, axis=-1, keepdims=True)
    mu = s1 * inv_f
    var = s2 * inv_f - mu * mu
    return (x - mu) * jax.lax.rsqrt(var + EPS) * gamma + beta


def critic_kernel(state_ref, action_ref,
                  w1_ref, b1_ref, g1_ref, be1_ref,
                  w2_ref, b2_ref, g2_ref, be2_ref,
                  w3_ref, b3_ref,
                  wq_ref, bq_ref,
                  q_ref):
    # Hoist the (1, F) parameter rows once per tile (single vreg loads).
    b1 = b1_ref[...]; g1 = g1_ref[...]; be1 = be1_ref[...]
    b2 = b2_ref[...]; g2 = g2_ref[...]; be2 = be2_ref[...]
    b3 = b3_ref[...]
    wq = wq_ref[...]; bq = bq_ref[...]

    # fc1 -> ln1 -> relu  (bf16 MXU operands, f32 accumulation / LN math)
    h1 = jnp.dot(state_ref[...], w1_ref[...],
                 preferred_element_type=jnp.float32) + b1
    x_s = jnp.maximum(_layernorm(h1, g1, be1), 0.0)

    # fc2 -> ln2
    h2 = jnp.dot(x_s.astype(jnp.bfloat16), w2_ref[...],
                 preferred_element_type=jnp.float32) + b2
    x_s2 = _layernorm(h2, g2, be2)

    # fc3 on the action branch
    x_a = jnp.dot(action_ref[...], w3_ref[...],
                  preferred_element_type=jnp.float32) + b3

    # Combine, relu; N=1 q head as VPU multiply + lane reduce (no MXU drain).
    x = jnp.maximum(x_s2 + x_a, 0.0)
    q_ref[...] = jnp.sum(x * wq, axis=-1, keepdims=True) + bq


def critic_forward(state, action, params, *, tile_b=1024):
    B, state_dim = state.shape
    action_dim = action.shape[1]
    fc1_dim = params["w1"].shape[1]
    fc2_dim = params["w2"].shape[1]

    # Batch tile: multiple of 8 sublanes, capped at tile_b; pad batch to it.
    tb = min(_round_up(tile_b, 8), _round_up(B, 8))
    b_pad = _round_up(B, tb)
    if b_pad != B:
        state = jnp.pad(state, ((0, b_pad - B), (0, 0)))
        action = jnp.pad(action, ((0, b_pad - B), (0, 0)))
    grid = (b_pad // tb,)

    # bf16 MXU operands; f32 accumulation and elementwise math in-kernel.
    state_bf = state.astype(jnp.bfloat16)
    action_bf = action.astype(jnp.bfloat16)
    w1 = params["w1"].astype(jnp.bfloat16)
    w2 = params["w2"].astype(jnp.bfloat16)
    w3 = params["w3"].astype(jnp.bfloat16)
    wq_row = jnp.reshape(params["wq"], (1, fc2_dim))  # (fc2, 1) -> (1, fc2)

    param_args = (w1, params["b1"], params["g1"], params["be1"],
                  w2, params["b2"], params["g2"], params["be2"],
                  w3, params["b3"],
                  wq_row, params["bq"])

    def batch_spec(arr):
        return pl.BlockSpec((tb, arr.shape[1]), lambda i: (i, 0))

    def const_spec(arr):
        return pl.BlockSpec(arr.shape, lambda i: (0, 0))

    in_specs = ([batch_spec(state_bf), batch_spec(action_bf)]
                + [const_spec(p) for p in param_args])
    out_specs = pl.BlockSpec((tb, 1), lambda i: (i, 0))

    # VMEM budget: double-buffered batch tiles + resident params + live acts.
    param_bytes = sum(int(p.size) * p.dtype.itemsize for p in param_args)
    tile_bytes = 2 * (tb * state_dim * 2 + tb * action_dim * 2 + tb * 1 * 4)
    act_bytes = tb * (fc1_dim + 3 * fc2_dim) * 4
    vmem_limit = int(2 * (tile_bytes + param_bytes + act_bytes)) + (4 << 20)
    vmem_limit = max(16 << 20, min(vmem_limit, 64 << 20))

    flops = 2 * b_pad * (state_dim * fc1_dim + fc1_dim * fc2_dim
                         + action_dim * fc2_dim + fc2_dim)
    bytes_accessed = (state_bf.size * 2 + action_bf.size * 2
                      + param_bytes + b_pad * 4)

    q = pl.pallas_call(
        critic_kernel,
        out_shape=jax.ShapeDtypeStruct((b_pad, 1), jnp.float32),
        grid=grid,
        in_specs=in_specs,
        out_specs=out_specs,
        compiler_params=pltpu.CompilerParams(
            dimension_semantics=("parallel",),
            vmem_limit_bytes=vmem_limit),
        cost_estimate=pl.CostEstimate(
            flops=flops, transcendentals=2 * b_pad,
            bytes_accessed=bytes_accessed),
    )(state_bf, action_bf, *param_args)

    return q[:B] if b_pad != B else q


def init_params(key, state_dim, action_dim, fc1_dim, fc2_dim):
    """Mirrors weight_init: xavier_normal_ for Linear weights, zero biases;
    LayerNorm weight=1, bias=0 (PyTorch defaults)."""
    def xavier_normal(k, fan_in, fan_out):
        std = (2.0 / (fan_in + fan_out)) ** 0.5
        # stored as (in, out) == transpose of PyTorch's (out, in)
        return std * jax.random.normal(k, (fan_in, fan_out), dtype=jnp.float32)

    k1, k2, k3, kq = jax.random.split(key, 4)
    return {
        "w1": xavier_normal(k1, state_dim, fc1_dim),
        "b1": jnp.zeros((1, fc1_dim), jnp.float32),
        "g1": jnp.ones((1, fc1_dim), jnp.float32),
        "be1": jnp.zeros((1, fc1_dim), jnp.float32),
        "w2": xavier_normal(k2, fc1_dim, fc2_dim),
        "b2": jnp.zeros((1, fc2_dim), jnp.float32),
        "g2": jnp.ones((1, fc2_dim), jnp.float32),
        "be2": jnp.zeros((1, fc2_dim), jnp.float32),
        "w3": xavier_normal(k3, action_dim, fc2_dim),
        "b3": jnp.zeros((1, fc2_dim), jnp.float32),
        "wq": xavier_normal(kq, fc2_dim, 1),
        "bq": jnp.zeros((1, 1), jnp.float32),
    }


if __name__ == "__main__":
    # Small shapes consistent with the module's forward.
    batch, state_dim, action_dim, fc1_dim, fc2_dim = 8, 16, 4, 64, 32

    key = jax.random.PRNGKey(0)
    kp, ks, ka = jax.random.split(key, 3)
    params = init_params(kp, state_dim, action_dim, fc1_dim, fc2_dim)
    state = jax.random.normal(ks, (batch, state_dim), dtype=jnp.float32)
    action = jax.random.normal(ka, (batch, action_dim), dtype=jnp.float32)

    q = critic_forward(state, action, params)
    jax.block_until_ready(q)
    assert q.shape == (batch, 1) and q.dtype == jnp.float32

    # Pure-JAX references.
    def ref(s, a, p, cast):
        c = (lambda x: x.astype(jnp.bfloat16)) if cast else (lambda x: x)
        h1 = jnp.dot(c(s), c(p["w1"]), preferred_element_type=jnp.float32) + p["b1"]
        mu = h1.mean(-1, keepdims=True); v = ((h1 - mu) ** 2).mean(-1, keepdims=True)
        xs = jnp.maximum((h1 - mu) / jnp.sqrt(v + EPS) * p["g1"] + p["be1"], 0.0)
        h2 = jnp.dot(c(xs), c(p["w2"]), preferred_element_type=jnp.float32) + p["b2"]
        mu2 = h2.mean(-1, keepdims=True); v2 = ((h2 - mu2) ** 2).mean(-1, keepdims=True)
        xs2 = (h2 - mu2) / jnp.sqrt(v2 + EPS) * p["g2"] + p["be2"]
        xa = jnp.dot(c(a), c(p["w3"]), preferred_element_type=jnp.float32) + p["b3"]
        x = jnp.maximum(xs2 + xa, 0.0)
        return x @ p["wq"] + p["bq"]

    # Same-math (bf16 MXU operands) reference: tight tolerance.
    q_bf_ref = ref(state, action, params, cast=True)
    assert jnp.allclose(q, q_bf_ref, atol=5e-3, rtol=5e-3)

    # Full-f32 reference of the original module: loose tolerance (bf16 matmuls).
    q_f32_ref = ref(state, action, params, cast=False)
    assert jnp.allclose(q, q_f32_ref, atol=5e-2, rtol=5e-2)

    print("KERNEL_OK")
</pallas_src>

<mosaic_0001>
module attributes {stable_mosaic.version = 11 : i64} {
  func.func @critic_kernel(%arg0: i32, %arg1: memref<8x16xbf16, #tpu.memory_space<vmem>>, %arg2: memref<8x4xbf16, #tpu.memory_space<vmem>>, %arg3: memref<16x64xbf16, #tpu.memory_space<vmem>>, %arg4: memref<1x64xf32, #tpu.memory_space<vmem>>, %arg5: memref<1x64xf32, #tpu.memory_space<vmem>>, %arg6: memref<1x64xf32, #tpu.memory_space<vmem>>, %arg7: memref<64x32xbf16, #tpu.memory_space<vmem>>, %arg8: memref<1x32xf32, #tpu.memory_space<vmem>>, %arg9: memref<1x32xf32, #tpu.memory_space<vmem>>, %arg10: memref<1x32xf32, #tpu.memory_space<vmem>>, %arg11: memref<4x32xbf16, #tpu.memory_space<vmem>>, %arg12: memref<1x32xf32, #tpu.memory_space<vmem>>, %arg13: memref<1x32xf32, #tpu.memory_space<vmem>>, %arg14: memref<1x1xf32, #tpu.memory_space<vmem>>, %arg15: memref<8x1xf32, #tpu.memory_space<vmem>>) attributes {dimension_semantics = [#tpu.dimension_semantics<parallel>], iteration_bounds = array<i64: 1>, scalar_prefetch = 0 : i64, scratch_operands = 0 : i64, tpu.core_type = #tpu.core_type<tc>, window_params = [{transform_indices = @transform_0, window_bounds = array<i64: 8, 16>}, {transform_indices = @transform_1, window_bounds = array<i64: 8, 4>}, {pipeline_mode = #tpu.pipeline_mode<synchronous>, transform_indices = @transform_2, window_bounds = array<i64: 16, 64>}, {pipeline_mode = #tpu.pipeline_mode<synchronous>, transform_indices = @transform_3, window_bounds = array<i64: 1, 64>}, {pipeline_mode = #tpu.pipeline_mode<synchronous>, transform_indices = @transform_4, window_bounds = array<i64: 1, 64>}, {pipeline_mode = #tpu.pipeline_mode<synchronous>, transform_indices = @transform_5, window_bounds = array<i64: 1, 64>}, {pipeline_mode = #tpu.pipeline_mode<synchronous>, transform_indices = @transform_6, window_bounds = array<i64: 64, 32>}, {pipeline_mode = #tpu.pipeline_mode<synchronous>, transform_indices = @transform_7, window_bounds = array<i64: 1, 32>}, {pipeline_mode = #tpu.pipeline_mode<synchronous>, transform_indices = @transform_8, window_bounds = array<i64: 1, 32>}, {pipeline_mode = #tpu.pipeline_mode<synchronous>, transform_indices = @transform_9, window_bounds = array<i64: 1, 32>}, {pipeline_mode = #tpu.pipeline_mode<synchronous>, transform_indices = @transform_10, window_bounds = array<i64: 4, 32>}, {pipeline_mode = #tpu.pipeline_mode<synchronous>, transform_indices = @transform_11, window_bounds = array<i64: 1, 32>}, {pipeline_mode = #tpu.pipeline_mode<synchronous>, transform_indices = @transform_12, window_bounds = array<i64: 1, 32>}, {pipeline_mode = #tpu.pipeline_mode<synchronous>, transform_indices = @transform_13, window_bounds = array<i64: 1, 1>}, {transform_indices = @transform_14, window_bounds = array<i64: 8, 1>}]} {
    %c0 = arith.constant 0 : index
    %c0_0 = arith.constant 0 : index
    %0 = vector.load %arg4[%c0, %c0_0] : memref<1x64xf32, #tpu.memory_space<vmem>>, vector<1x64xf32>
    %c0_1 = arith.constant 0 : index
    %c0_2 = arith.constant 0 : index
    %1 = vector.load %arg5[%c0_1, %c0_2] : memref<1x64xf32, #tpu.memory_space<vmem>>, vector<1x64xf32>
    %c0_3 = arith.constant 0 : index
    %c0_4 = arith.constant 0 : index
    %2 = vector.load %arg6[%c0_3, %c0_4] : memref<1x64xf32, #tpu.memory_space<vmem>>, vector<1x64xf32>
    %c0_5 = arith.constant 0 : index
    %c0_6 = arith.constant 0 : index
    %3 = vector.load %arg8[%c0_5, %c0_6] : memref<1x32xf32, #tpu.memory_space<vmem>>, vector<1x32xf32>
    %c0_7 = arith.constant 0 : index
    %c0_8 = arith.constant 0 : index
    %4 = vector.load %arg9[%c0_7, %c0_8] : memref<1x32xf32, #tpu.memory_space<vmem>>, vector<1x32xf32>
    %c0_9 = arith.constant 0 : index
    %c0_10 = arith.constant 0 : index
    %5 = vector.load %arg10[%c0_9, %c0_10] : memref<1x32xf32, #tpu.memory_space<vmem>>, vector<1x32xf32>
    %c0_11 = arith.constant 0 : index
    %c0_12 = arith.constant 0 : index
    %6 = vector.load %arg12[%c0_11, %c0_12] : memref<1x32xf32, #tpu.memory_space<vmem>>, vector<1x32xf32>
    %c0_13 = arith.constant 0 : index
    %c0_14 = arith.constant 0 : index
    %7 = vector.load %arg13[%c0_13, %c0_14] : memref<1x32xf32, #tpu.memory_space<vmem>>, vector<1x32xf32>
    %c0_15 = arith.constant 0 : index
    %c0_16 = arith.constant 0 : index
    %8 = vector.load %arg14[%c0_15, %c0_16] : memref<1x1xf32, #tpu.memory_space<vmem>>, vector<1x1xf32>
    %c0_17 = arith.constant 0 : index
    %c0_18 = arith.constant 0 : index
    %9 = vector.load %arg1[%c0_17, %c0_18] : memref<8x16xbf16, #tpu.memory_space<vmem>>, vector<8x16xbf16>
    %c0_19 = arith.constant 0 : index
    %c0_20 = arith.constant 0 : index
    %10 = vector.load %arg3[%c0_19, %c0_20] : memref<16x64xbf16, #tpu.memory_space<vmem>>, vector<16x64xbf16>
    %cst = arith.constant dense<0.000000e+00> : vector<8x64xf32>
    %11 = tpu.matmul %9, %10, %cst {dimension_numbers = #tpu.dot_dimension_numbers<[1], [0], [0], [1], [0, 0, 1, 1], [], []>} : vector<8x16xbf16>, vector<16x64xbf16>, vector<8x64xf32> -> vector<8x64xf32>
    %12 = vector.broadcast %0 : vector<1x64xf32> to vector<8x64xf32>
    %13 = arith.addf %11, %12 : vector<8x64xf32>
    %cst_21 = arith.constant dense<0.000000e+00> : vector<8xf32>
    %14 = vector.multi_reduction <add>, %13, %cst_21 [1] : vector<8x64xf32> to vector<8xf32>
    %15 = vector.shape_cast %14 : vector<8xf32> to vector<8x1xf32>
    %16 = arith.mulf %13, %13 : vector<8x64xf32>
    %cst_22 = arith.constant dense<0.000000e+00> : vector<8xf32>
    %17 = vector.multi_reduction <add>, %16, %cst_22 [1] : vector<8x64xf32> to vector<8xf32>
    %18 = vector.shape_cast %17 : vector<8xf32> to vector<8x1xf32>
    %cst_23 = arith.constant 1.562500e-02 : f32
    %19 = vector.broadcast %cst_23 : f32 to vector<8x1xf32>
    %20 = arith.mulf %15, %19 : vector<8x1xf32>
    %cst_24 = arith.constant 1.562500e-02 : f32
    %21 = vector.broadcast %cst_24 : f32 to vector<8x1xf32>
    %22 = arith.mulf %18, %21 : vector<8x1xf32>
    %23 = arith.mulf %20, %20 : vector<8x1xf32>
    %24 = arith.subf %22, %23 : vector<8x1xf32>
    %25 = vector.broadcast %20 : vector<8x1xf32> to vector<8x64xf32>
    %26 = arith.subf %13, %25 : vector<8x64xf32>
    %cst_25 = arith.constant 9.99999974E-6 : f32
    %27 = vector.broadcast %cst_25 : f32 to vector<8x1xf32>
    %28 = arith.addf %24, %27 : vector<8x1xf32>
    %29 = math.rsqrt %28 : vector<8x1xf32>
    %30 = vector.broadcast %29 : vector<8x1xf32> to vector<8x64xf32>
    %31 = arith.mulf %26, %30 : vector<8x64xf32>
    %32 = vector.broadcast %1 : vector<1x64xf32> to vector<8x64xf32>
    %33 = arith.mulf %31, %32 : vector<8x64xf32>
    %34 = vector.broadcast %2 : vector<1x64xf32> to vector<8x64xf32>
    %35 = arith.addf %33, %34 : vector<8x64xf32>
    %cst_26 = arith.constant 0.000000e+00 : f32
    %36 = vector.broadcast %cst_26 : f32 to vector<8x64xf32>
    %37 = arith.maximumf %35, %36 : vector<8x64xf32>
    %38 = arith.truncf %37 : vector<8x64xf32> to vector<8x64xbf16>
    %c0_27 = arith.constant 0 : index
    %c0_28 = arith.constant 0 : index
    %39 = vector.load %arg7[%c0_27, %c0_28] : memref<64x32xbf16, #tpu.memory_space<vmem>>, vector<64x32xbf16>
    %cst_29 = arith.constant dense<0.000000e+00> : vector<8x32xf32>
    %40 = tpu.matmul %38, %39, %cst_29 {dimension_numbers = #tpu.dot_dimension_numbers<[1], [0], [0], [1], [0, 0, 1, 1], [], []>} : vector<8x64xbf16>, vector<64x32xbf16>, vector<8x32xf32> -> vector<8x32xf32>
    %41 = vector.broadcast %3 : vector<1x32xf32> to vector<8x32xf32>
    %42 = arith.addf %40, %41 : vector<8x32xf32>
    %cst_30 = arith.constant dense<0.000000e+00> : vector<8xf32>
    %43 = vector.multi_reduction <add>, %42, %cst_30 [1] : vector<8x32xf32> to vector<8xf32>
    %44 = vector.shape_cast %43 : vector<8xf32> to vector<8x1xf32>
    %45 = arith.mulf %42, %42 : vector<8x32xf32>
    %cst_31 = arith.constant dense<0.000000e+00> : vector<8xf32>
    %46 = vector.multi_reduction <add>, %45, %cst_31 [1] : vector<8x32xf32> to vector<8xf32>
    %47 = vector.shape_cast %46 : vector<8xf32> to vector<8x1xf32>
    %cst_32 = arith.constant 3.125000e-02 : f32
    %48 = vector.broadcast %cst_32 : f32 to vector<8x1xf32>
    %49 = arith.mulf %44, %48 : vector<8x1xf32>
    %cst_33 = arith.constant 3.125000e-02 : f32
    %50 = vector.broadcast %cst_33 : f32 to vector<8x1xf32>
    %51 = arith.mulf %47, %50 : vector<8x1xf32>
    %52 = arith.mulf %49, %49 : vector<8x1xf32>
    %53 = arith.subf %51, %52 : vector<8x1xf32>
    %54 = vector.broadcast %49 : vector<8x1xf32> to vector<8x32xf32>
    %55 = arith.subf %42, %54 : vector<8x32xf32>
    %cst_34 = arith.constant 9.99999974E-6 : f32
    %56 = vector.broadcast %cst_34 : f32 to vector<8x1xf32>
    %57 = arith.addf %53, %56 : vector<8x1xf32>
    %58 = math.rsqrt %57 : vector<8x1xf32>
    %59 = vector.broadcast %58 : vector<8x1xf32> to vector<8x32xf32>
    %60 = arith.mulf %55, %59 : vector<8x32xf32>
    %61 = vector.broadcast %4 : vector<1x32xf32> to vector<8x32xf32>
    %62 = arith.mulf %60, %61 : vector<8x32xf32>
    %63 = vector.broadcast %5 : vector<1x32xf32> to vector<8x32xf32>
    %64 = arith.addf %62, %63 : vector<8x32xf32>
    %c0_35 = arith.constant 0 : index
    %c0_36 = arith.constant 0 : index
    %65 = vector.load %arg2[%c0_35, %c0_36] : memref<8x4xbf16, #tpu.memory_space<vmem>>, vector<8x4xbf16>
    %c0_37 = arith.constant 0 : index
    %c0_38 = arith.constant 0 : index
    %66 = vector.load %arg11[%c0_37, %c0_38] : memref<4x32xbf16, #tpu.memory_space<vmem>>, vector<4x32xbf16>
    %cst_39 = arith.constant dense<0.000000e+00> : vector<8x32xf32>
    %67 = tpu.matmul %65, %66, %cst_39 {dimension_numbers = #tpu.dot_dimension_numbers<[1], [0], [0], [1], [0, 0, 1, 1], [], []>} : vector<8x4xbf16>, vector<4x32xbf16>, vector<8x32xf32> -> vector<8x32xf32>
    %68 = vector.broadcast %6 : vector<1x32xf32> to vector<8x32xf32>
    %69 = arith.addf %67, %68 : vector<8x32xf32>
    %70 = arith.addf %64, %69 : vector<8x32xf32>
    %cst_40 = arith.constant 0.000000e+00 : f32
    %71 = vector.broadcast %cst_40 : f32 to vector<8x32xf32>
    %72 = arith.maximumf %70, %71 : vector<8x32xf32>
    %73 = vector.broadcast %7 : vector<1x32xf32> to vector<8x32xf32>
    %74 = arith.mulf %72, %73 : vector<8x32xf32>
    %cst_41 = arith.constant dense<0.000000e+00> : vector<8xf32>
    %75 = vector.multi_reduction <add>, %74, %cst_41 [1] : vector<8x32xf32> to vector<8xf32>
    %76 = vector.shape_cast %75 : vector<8xf32> to vector<8x1xf32>
    %77 = vector.broadcast %8 : vector<1x1xf32> to vector<8x1xf32>
    %78 = arith.addf %76, %77 : vector<8x1xf32>
    %c0_42 = arith.constant 0 : index
    %c0_43 = arith.constant 0 : index
    %79 = vector.load %arg15[%c0_42, %c0_43] : memref<8x1xf32, #tpu.memory_space<vmem>>, vector<8x1xf32>
    tpu.vector_store %arg15[%c0_42, %c0_43], %78 {strides = array<i32>} : memref<8x1xf32, #tpu.memory_space<vmem>>, vector<8x1xf32>,
    return
  }
  func.func @transform_0(%arg0: i32) -> (i32, i32) {
    %c0_i32 = arith.constant 0 : i32
    %c0_i32_0 = arith.constant 0 : i32
    return %arg0, %c0_i32 : i32, i32
  }
  func.func @transform_1(%arg0: i32) -> (i32, i32) {
    %c0_i32 = arith.constant 0 : i32
    %c0_i32_0 = arith.constant 0 : i32
    return %arg0, %c0_i32 : i32, i32
  }
  func.func @transform_2(%arg0: i32) -> (i32, i32) {
    %c0_i32 = arith.constant 0 : i32
    %c0_i32_0 = arith.constant 0 : i32
    %c0_i32_1 = arith.constant 0 : i32
    return %c0_i32, %c0_i32_0 : i32, i32
  }
  func.func @transform_3(%arg0: i32) -> (i32, i32) {
    %c0_i32 = arith.constant 0 : i32
    %c0_i32_0 = arith.constant 0 : i32
    %c0_i32_1 = arith.constant 0 : i32
    return %c0_i32, %c0_i32_0 : i32, i32
  }
  func.func @transform_4(%arg0: i32) -> (i32, i32) {
    %c0_i32 = arith.constant 0 : i32
    %c0_i32_0 = arith.constant 0 : i32
    %c0_i32_1 = arith.constant 0 : i32
    return %c0_i32, %c0_i32_0 : i32, i32
  }
  func.func @transform_5(%arg0: i32) -> (i32, i32) {
    %c0_i32 = arith.constant 0 : i32
    %c0_i32_0 = arith.constant 0 : i32
    %c0_i32_1 = arith.constant 0 : i32
    return %c0_i32, %c0_i32_0 : i32, i32
  }
  func.func @transform_6(%arg0: i32) -> (i32, i32) {
    %c0_i32 = arith.constant 0 : i32
    %c0_i32_0 = arith.constant 0 : i32
    %c0_i32_1 = arith.constant 0 : i32
    return %c0_i32, %c0_i32_0 : i32, i32
  }
  func.func @transform_7(%arg0: i32) -> (i32, i32) {
    %c0_i32 = arith.constant 0 : i32
    %c0_i32_0 = arith.constant 0 : i32
    %c0_i32_1 = arith.constant 0 : i32
    return %c0_i32, %c0_i32_0 : i32, i32
  }
  func.func @transform_8(%arg0: i32) -> (i32, i32) {
    %c0_i32 = arith.constant 0 : i32
    %c0_i32_0 = arith.constant 0 : i32
    %c0_i32_1 = arith.constant 0 : i32
    return %c0_i32, %c0_i32_0 : i32, i32
  }
  func.func @transform_9(%arg0: i32) -> (i32, i32) {
    %c0_i32 = arith.constant 0 : i32
    %c0_i32_0 = arith.constant 0 : i32
    %c0_i32_1 = arith.constant 0 : i32
    return %c0_i32, %c0_i32_0 : i32, i32
  }
  func.func @transform_10(%arg0: i32) -> (i32, i32) {
    %c0_i32 = arith.constant 0 : i32
    %c0_i32_0 = arith.constant 0 : i32
    %c0_i32_1 = arith.constant 0 : i32
    return %c0_i32, %c0_i32_0 : i32, i32
  }
  func.func @transform_11(%arg0: i32) -> (i32, i32) {
    %c0_i32 = arith.constant 0 : i32
    %c0_i32_0 = arith.constant 0 : i32
    %c0_i32_1 = arith.constant 0 : i32
    return %c0_i32, %c0_i32_0 : i32, i32
  }
  func.func @transform_12(%arg0: i32) -> (i32, i32) {
    %c0_i32 = arith.constant 0 : i32
    %c0_i32_0 = arith.constant 0 : i32
    %c0_i32_1 = arith.constant 0 : i32
    return %c0_i32, %c0_i32_0 : i32, i32
  }
  func.func @transform_13(%arg0: i32) -> (i32, i32) {
    %c0_i32 = arith.constant 0 : i32
    %c0_i32_0 = arith.constant 0 : i32
    %c0_i32_1 = arith.constant 0 : i32
    return %c0_i32, %c0_i32_0 : i32, i32
  }
  func.func @transform_14(%arg0: i32) -> (i32, i32) {
    %c0_i32 = arith.constant 0 : i32
    %c0_i32_0 = arith.constant 0 : i32
    return %arg0, %c0_i32 : i32, i32
  }
}

</mosaic_0001>

<bundles_post_ra>
// kernel: tpu_custom_call.1
= control target key start
LH: loop header
LB: loop body
LE: loop exit
PB: predicated region body
PF: predicated region fallthrough
CT: control target
= control target key end

     0   :  { %v403_v0 = vmov 0.0   ;;  %vm404_vm0 = vmmov 0   ;;  %vm74_vm1 = vcmask 130048   ;;  %vm118_vm2 = vcmask 523264   ;;  %s540_s2 = inlined_call_operand.vmem [shape: bf16[16,64], index: 2, kind: input, shape index: {}]   ;;  %s541_s0 = inlined_call_operand.vmem [shape: bf16[8,16], index: 0, kind: input, shape index: {}]   ;;  %s542_s3 = inlined_call_operand.vmem [shape: f32[1,64], index: 3, kind: input, shape index: {}]   ;;  %s543_s6 = inlined_call_operand.vmem [shape: bf16[64,32], index: 6, kind: input, shape index: {}]   ;;  %s544_s10 = inlined_call_operand.vmem [shape: bf16[4,32], index: 10, kind: input, shape index: {}]   ;;  %s545_s1 = inlined_call_operand.vmem [shape: bf16[8,4], index: 1, kind: input, shape index: {}]   ;;  %s546_s4 = inlined_call_operand.vmem [shape: f32[1,64], index: 4, kind: input, shape index: {}]   ;;  %s547_s5 = inlined_call_operand.vmem [shape: f32[1,64], index: 5, kind: input, shape index: {}]   ;;  %s548_s7 = inlined_call_operand.vmem [shape: f32[1,32], index: 7, kind: input, shape index: {}]   ;;  %s549_s13 = inlined_call_operand.<no memory space> [shape: f32[1,1], index: 13, kind: input, shape index: {}]   ;;  %s550_s8 = inlined_call_operand.vmem [shape: f32[1,32], index: 8, kind: input, shape index: {}]   ;;  %s551_s11 = inlined_call_operand.vmem [shape: f32[1,32], index: 11, kind: input, shape index: {}]   ;;  %s552_s9 = inlined_call_operand.vmem [shape: f32[1,32], index: 9, kind: input, shape index: {}]   ;;  %s553_s12 = inlined_call_operand.vmem [shape: f32[1,32], index: 12, kind: input, shape index: {}]   ;;  %s554_s14 = inlined_call_operand.vmem [shape: f32[8,1], index: 14, kind: output, shape index: {}]  }
   0x1   :  { %368 = vmatprep.subr.bf16.mxu0 %v403_v0  ;;  %v394_v1 = vld [vmem:[%s540_s2] sm:$0xff]   ;;  %370 = vmatprep.mubr.msk.bf16.mxu0 %vm404_vm0, %v403_v0  ;;  %v396_v13 = vld [vmem:[%s543_s6 + $0x8] sm:$0xff]   ;;  %v397_v14 = vld [vmem:[%s543_s6 + $0x10] sm:$0xff]   ;;  %vm273_vm3 = vcmask 1041408   ;;  %vm269_vm4 = vcmask 31744   ;;  %vm231_vm5 = vcmask 261120   ;;  %v19_v48 = vstv %s549_s13 }
   0x2   :  { %374 = vmatprep.subr.bf16.mxu1 %v403_v0  ;;  %382 = vmatprep.mubr.msk.bf16.mxu1 %vm404_vm0, %v403_v0  ;;  %v59_v2 = vld [vmem:[%s541_s0] sm:$0xf]  ;;  %v398_v15 = vld [vmem:[%s543_s6 + $0x18] sm:$0xff]   ;;  %20 = vst [vmem:[#allocation2] sm:$0x1] %v19_v48  ;;  %vm336_vm6 = vcmask 7168  }
   0x3   :  { %369 = vmatpush3.bf16.msra.mxu0 %v394_v1  ;;  %v342_v3 = vld [vmem:[%s542_s3] ss:$0 sm:$0xff] }
   0x4   :  { %386 = vmatprep.subr.bf16.mxu0 %v403_v0  ;;  %v395_v12 = vld [vmem:[%s543_s6] sm:$0xff]  }
   0x5   :  { %375 = vmatpush3.bf16.msra.mxu1 %v395_v12  ;;  %v262_v16 = vld [vmem:[%s544_s10] sm:$0x3] }
   0x6   :  { %371 = vmatmul.mubr.msk.bf16.vlgmr.msra.gmra.mrb[0].mxu0 %vm74_vm1, %v59_v2  ;;  %376 = vmatprep.subr.bf16.mxu1 %v403_v0  ;;  %v275_v17 = vsel %vm273_vm3, %v262_v16, 0  ;;  %v261_v18 = vld [vmem:[%s545_s1] sm:$0xf] }
   0x7   :  { %388 = vmatprep.mubr.msk.bf16.mxu0 %vm404_vm0, %v403_v0  ;;  %387 = vmatpush3.bf16.msra.mxu0 %v275_v17  ;;  %v345_v28 = vld [vmem:[%s546_s4] ss:$0 sm:$0xff] }
   0x8   :  { %v346_v30 = vld [vmem:[%s547_s5] ss:$0 sm:$0xff] }
   0x9   :  { %377 = vmatpush3.bf16.msra.mxu1 %v396_v13  ;;  %v347_v35 = vld [vmem:[%s548_s7] ss:$0 sm:$0xff] }
   0xa   :  { %378 = vmatprep.subr.bf16.mxu1 %v403_v0  ;;  %v353_v58 = vld [vmem:[%s550_s8] ss:$0 sm:$0xff] }
   0xb   :  { %v355_v59 = vld [vmem:[%s551_s11] ss:$0 sm:$0xff] }
   0xc   :  { %v354_v61 = vld [vmem:[%s552_s9] ss:$0 sm:$0xff] }
   0xd   :  { %379 = vmatpush3.bf16.msra.mxu1 %v397_v14  ;;  %v357_v2 = vld [vmem:[%s553_s12] ss:$0 sm:$0xff] }
   0xe   :  { %380 = vmatprep.subr.bf16.mxu1 %v403_v0  ;;  %389 = vmatmul.mubr.msk.bf16.vlgmr.msra.gmra.mrb[4].mxu0 %vm269_vm4, %v261_v18 }
  0x11   :  { %381 = vmatpush3.bf16.msra.mxu1 %v398_v15 }
  0xd9   :  { %v112_v4 = vpop.f32.mrb[0].mxu0 }
  0xda   :  { %v113_v5 = vadd.f32 %v342_v3, %v112_v4  ;;  %v372_v6 = vpop.f32.mrb[1].mxu0 }
  0xdb   :  { %v115_v7 = vpop.f32.mrb[2].mxu0  ;;  %v358_v6 = vld [vmem:[#allocation2] ss:$0 sm:$0xff] }
  0xdc   :  { %v373_v8 = vpop.f32.mrb[3].mxu0  ;;  %v119_v9 = vsel %vm118_vm2, %v113_v5, 0.0  ;;  %v122_v10 = vmul.f32 %v113_v5, %v113_v5 }
  0xdd   :  { %120 = vadd.xlane.f32.xlu0 %v119_v9 }
  0xde   :  { %v123_v11 = vsel %vm118_vm2, %v122_v10, 0.0 }
  0xe1   :  { %124 = vadd.xlane.f32.xlu0 %v123_v11  ;;  %v311_v44 = vpop.f32.mrb[4].mxu0 }
  0xe2   :  { %v390_v45 = vpop.f32.mrb[5].mxu0  ;;  %v312_v63 = vadd.f32 %v355_v59, %v311_v44 }
  0xe3   :  { %v314_v46 = vpop.f32.mrb[6].mxu0 }
  0xe4   :  { %v391_v47 = vpop.f32.mrb[7].mxu0 }
 0x16a   :  { %v121_v19 = vpop.xlane.xlu0 %120 }
 0x16b   :  { %v126_v20 = vmul.f32 0.015625, %v121_v19 }
 0x16d   :  { %v128_v22 = vmul.f32 %v126_v20, %v126_v20  ;;  %v130_v26 = vsub.f32 %v113_v5, %v126_v20 }
 0x16e   :  { %v125_v21 = vpop.xlane.xlu0 %124 }
 0x16f   :  { %v127_v23 = vmul.f32 0.015625, %v125_v21 }
 0x171   :  { %v129_v24 = vsub.f32 %v127_v23, %v128_v22 }
 0x173   :  { %v131_v25 = vadd.f32 1e-05, %v129_v24 }
 0x175   :  { %399 = vrsqrt.f32 %v131_v25 }
 0x17f   :  { %v400_v27 = vpop.eup %399 }
 0x180   :  { %v133_v29 = vmul.f32 %v400_v27, %v130_v26 }
 0x182   :  { %v140_v31 = vmul.f32 %v345_v28, %v133_v29 }
 0x184   :  { %v147_v32 = vadd.f32 %v346_v30, %v140_v31 }
 0x186   :  { %v148_v33 = vmax.f32 %v147_v32, 0.0 }
 0x188   :  { %v149_v34 = vpack.c.bf16 %v148_v33, %v148_v33 }
 0x18a   :  { %383 = vmatmul.mubr.msk.bf16.vlgmr.msra.gmra.mrb[0].mxu1 %vm118_vm2, %v149_v34 }
 0x25d   :  { %v225_v36 = vpop.f32.mrb[0].mxu1 }
 0x25e   :  { %v226_v37 = vadd.f32 %v347_v35, %v225_v36  ;;  %v384_v38 = vpop.f32.mrb[1].mxu1 }
 0x25f   :  { %v228_v39 = vpop.f32.mrb[2].mxu1 }
 0x260   :  { %v385_v40 = vpop.f32.mrb[3].mxu1  ;;  %v232_v41 = vsel %vm231_vm5, %v226_v37, 0.0  ;;  %v235_v42 = vmul.f32 %v226_v37, %v226_v37 }
 0x261   :  { %233 = vadd.xlane.f32.xlu1 %v232_v41 }
 0x262   :  { %v236_v43 = vsel %vm231_vm5, %v235_v42, 0.0 }
 0x265   :  { %237 = vadd.xlane.f32.xlu1 %v236_v43 }
 0x2ee   :  { %v234_v49 = vpop.xlane.xlu1 %233 }
 0x2ef   :  { %v239_v50 = vmul.f32 0.03125, %v234_v49 }
 0x2f1   :  { %v241_v52 = vmul.f32 %v239_v50, %v239_v50  ;;  %v243_v56 = vsub.f32 %v226_v37, %v239_v50 }
 0x2f2   :  { %v238_v51 = vpop.xlane.xlu1 %237 }
 0x2f3   :  { %v240_v53 = vmul.f32 0.03125, %v238_v51 }
 0x2f5   :  { %v242_v54 = vsub.f32 %v240_v53, %v241_v52 }
 0x2f7   :  { %v244_v55 = vadd.f32 1e-05, %v242_v54 }
 0x2f9   :  { %401 = vrsqrt.f32 %v244_v55 }
 0x303   :  { %v402_v57 = vpop.eup %401 }
 0x304   :  { %v246_v60 = vmul.f32 %v402_v57, %v243_v56 }
 0x306   :  { %v253_v62 = vmul.f32 %v353_v58, %v246_v60 }
 0x308   :  { %v260_v0 = vadd.f32 %v354_v61, %v253_v62 }
 0x30a   :  { %v317_v1 = vadd.f32 %v312_v63, %v260_v0 }
 0x30c   :  { %v318_v3 = vmax.f32 %v317_v1, 0.0 }
 0x30e   :  { %v325_v4 = vmul.f32 %v357_v2, %v318_v3 }
 0x310   :  { %v326_v5 = vsel %vm231_vm5, %v325_v4, 0.0 }
 0x311   :  { %327 = vadd.xlane.f32.xlu0 %v326_v5 }
 0x39e   :  { %v328_v7 = vpop.xlane.xlu0 %327 }
 0x39f   :  { %v335_v8 = vadd.f32 %v358_v6, %v328_v7 }
 0x3a1   :  { %337 = vst.msk [vmem:[%s554_s14] sm:$0xff] %vm336_vm6, %v335_v8 }

</bundles_post_ra>
